<compile_context>
chip_gen: v5e
topology: v5e:2x2
jax: 0.10.0
libtpu: 0.0.40
codegen_flags: <defaults>
</compile_context>

<pallas_src>
import functools

import jax
import jax.numpy as jnp
from jax import lax
from jax.experimental import pallas as pl
from jax.experimental.pallas import tpu as pltpu


def _nn_kernel(x_ref, w1_ref, b1_ref, w2_ref, b2_ref, w3_ref, b3_ref, o_ref):
    # x tile: [TB, D] (possibly bf16 from HBM); compute in f32.
    x = x_ref[...].astype(jnp.float32)                              # [TB, D]

    # fc1 (+ folded bn1) -> relu, computed transposed: (16, D) . (TB, D)^T
    h = lax.dot_general(w1_ref[...], x, (((1,), (1,)), ((), ())),
                        preferred_element_type=jnp.float32)          # [16, TB]
    h = jnp.maximum(h + b1_ref[...], 0.0)

    # fc2 (+ folded bn2) -> relu
    h = jnp.dot(w2_ref[...], h, preferred_element_type=jnp.float32)  # [8, TB]
    h = jnp.maximum(h + b2_ref[...], 0.0)

    # fc3 -> relu
    h = jnp.dot(w3_ref[...], h, preferred_element_type=jnp.float32)  # [1, TB]
    h = jnp.maximum(h + b3_ref[...], 0.0)

    o_ref[...] = h.astype(o_ref.dtype)                               # lane-dense store


def _batch_dim_semantics(num_blocks):
    """CORE_PARALLEL on v7x so both TensorCores stream disjoint batch tiles;
    plain 'parallel' on single-TC chips (v5e/v6e)."""
    try:
        kind = jax.devices()[0].device_kind.lower()
        if num_blocks >= 2 and ("v7" in kind or "7x" in kind):
            cp = getattr(pltpu, "CORE_PARALLEL", None)
            if cp is not None:
                return (cp,)
    except Exception:
        pass
    return ("parallel",)


@functools.partial(jax.jit, static_argnames=("block_b", "compute_dtype"))
def nn_forward(x, folded_params, *, block_b=8192, compute_dtype=jnp.bfloat16):
    """x: [B, input_len] float32.  folded_params: (w1, b1, w2, b2, w3, b3) in
    PyTorch orientation (W: [out, in], b: [out, 1]) with eval-mode BatchNorm
    already folded in (see fold_params).  Returns [B, 1] float32."""
    w1, b1, w2, b2, w3, b3 = folded_params
    B, D = x.shape

    # Stream x in a narrower dtype (halves HBM read traffic when bf16); the
    # in-kernel math stays f32.
    x = x.astype(compute_dtype)

    tb = B if B <= block_b else block_b
    num_blocks = pl.cdiv(B, tb)
    grid = (num_blocks,)

    def x_map(i):
        return (i, 0)

    def o_map(i):
        return (0, i)

    def const_map(i):          # params: VMEM-resident, never re-DMA'd
        return (0, 0)

    in_specs = [
        pl.BlockSpec((tb, D), x_map),              # x: tiled over batch
        pl.BlockSpec(w1.shape, const_map),
        pl.BlockSpec(b1.shape, const_map),
        pl.BlockSpec(w2.shape, const_map),
        pl.BlockSpec(b2.shape, const_map),
        pl.BlockSpec(w3.shape, const_map),
        pl.BlockSpec(b3.shape, const_map),
    ]
    out_spec = pl.BlockSpec((1, tb), o_map)        # lane-dense output slab

    # Explicit VMEM budget: double-buffered x tiles (minor dim D pads to 128
    # lanes), double-buffered (1, tb) out tiles (1 pads to 8 sublanes), plus
    # in-kernel f32 intermediates (x-cast copy + lane-dense h1/h2/h3), plus
    # headroom for the tiny resident weights.
    itemsize = jnp.dtype(compute_dtype).itemsize
    x_buf = 2 * tb * 128 * itemsize
    out_buf = 2 * 8 * tb * 4
    interm = tb * 4 * (128 + 16 + 8 + 8)
    vmem_limit = min(int(1.5 * (x_buf + out_buf + interm)) + (4 << 20), 56 << 20)

    # Advisory cost estimate so XLA schedules producers/consumers sensibly
    # around this long, memory-bound custom call.
    flops = 2 * B * (D * 16 + 16 * 8 + 8 * 1)
    weight_bytes = 4 * (16 * D + 16 + 8 * 16 + 8 + 8 + 1)
    bytes_accessed = B * D * itemsize + B * 4 + weight_bytes
    cost = pl.CostEstimate(flops=flops, transcendentals=0,
                           bytes_accessed=bytes_accessed)

    out = pl.pallas_call(
        _nn_kernel,
        grid=grid,
        in_specs=in_specs,
        out_specs=out_spec,
        out_shape=jax.ShapeDtypeStruct((1, B), jnp.float32),
        compiler_params=pltpu.CompilerParams(
            dimension_semantics=_batch_dim_semantics(num_blocks),
            vmem_limit_bytes=vmem_limit,
        ),
        cost_estimate=cost,
    )(x, w1, b1, w2, b2, w3, b3)

    return out.reshape(B, 1)


def fold_params(params):
    """Fold eval-mode BatchNorm (scale s, shift t, both [out,1]) into the
    preceding Linear (torch orientation W:[out,in], b:[out,1]):
        (x @ W.T + b.T) * s.T + t.T == x @ (W*s).T + (b*s + t).T
    ReLU commutes with this exact algebraic fold."""
    w1 = params["w1"] * params["s1"]
    b1 = params["b1"] * params["s1"] + params["t1"]
    w2 = params["w2"] * params["s2"]
    b2 = params["b2"] * params["s2"] + params["t2"]
    return (w1, b1, w2, b2, params["w3"], params["b3"])


def init_params(key, input_len):
    """Deterministic parameters mirroring the PyTorch module.

    Linear weights are kept in torch orientation ([out, in]); biases / BN
    scale-shift as column vectors ([out, 1]) so they broadcast over the
    kernel's transposed (features, batch) intermediates.  BatchNorm (eval):
        scale = gamma / sqrt(running_var + eps), shift = beta - running_mean * scale
    with PyTorch defaults gamma=1, beta=0, running_mean=0, running_var=1.
    """
    eps = 1e-5
    k1, k2, k3 = jax.random.split(key, 3)

    def lin(k, fan_in, fan_out):
        bound = float(fan_in) ** -0.5
        kw, kb = jax.random.split(k)
        w = jax.random.uniform(kw, (fan_out, fan_in), jnp.float32, -bound, bound)
        b = jax.random.uniform(kb, (fan_out, 1), jnp.float32, -bound, bound)
        return w, b

    w1, b1 = lin(k1, input_len, 16)
    w2, b2 = lin(k2, 16, 8)
    w3, b3 = lin(k3, 8, 1)

    def bn_affine(n):
        gamma = jnp.ones((n, 1), jnp.float32)
        beta = jnp.zeros((n, 1), jnp.float32)
        running_mean = jnp.zeros((n, 1), jnp.float32)
        running_var = jnp.ones((n, 1), jnp.float32)
        scale = gamma / jnp.sqrt(running_var + eps)
        shift = beta - running_mean * scale
        return scale, shift

    s1, t1 = bn_affine(16)
    s2, t2 = bn_affine(8)

    return dict(w1=w1, b1=b1, s1=s1, t1=t1,
                w2=w2, b2=b2, s2=s2, t2=t2,
                w3=w3, b3=b3)


def nn_forward_ref(x, p):
    """Pure-JAX reference (unfolded BN, torch-orientation weights)."""
    h = jnp.maximum((x @ p["w1"].T + p["b1"].T) * p["s1"].T + p["t1"].T, 0.0)
    h = jnp.maximum((h @ p["w2"].T + p["b2"].T) * p["s2"].T + p["t2"].T, 0.0)
    h = jnp.maximum(h @ p["w3"].T + p["b3"].T, 0.0)
    return h


if __name__ == "__main__":
    key = jax.random.PRNGKey(0)
    kx, kp = jax.random.split(key)

    batch, input_len = 256, 32
    x = jax.random.normal(kx, (batch, input_len), jnp.float32)
    params = init_params(kp, input_len)
    folded = fold_params(params)

    ref = nn_forward_ref(x, params)

    # f32 path; block_b=128 exercises the multi-tile batch grid (grid=(2,)).
    out_f32 = jax.block_until_ready(
        nn_forward(x, folded, block_b=128, compute_dtype=jnp.float32))
    assert out_f32.shape == (batch, 1)
    assert jnp.allclose(out_f32, ref, atol=2e-2, rtol=2e-2), "f32 path mismatch"

    # Default bf16-input path (halves HBM x traffic); compare against a
    # reference fed the same bf16-rounded inputs.
    out_bf16 = jax.block_until_ready(nn_forward(x, folded, block_b=128))
    ref_bf16 = nn_forward_ref(x.astype(jnp.bfloat16).astype(jnp.float32), params)
    assert out_bf16.shape == (batch, 1)
    assert jnp.allclose(out_bf16, ref_bf16, atol=2e-2, rtol=2e-2), "bf16 path mismatch"

    # Single-tile (full-batch block) path at the default large block_b.
    out_one = jax.block_until_ready(nn_forward(x, folded, compute_dtype=jnp.float32))
    assert jnp.allclose(out_one, ref, atol=2e-2, rtol=2e-2), "single-tile mismatch"

    print("KERNEL_OK")
</pallas_src>

<mosaic_0001>
module attributes {stable_mosaic.version = 11 : i64} {
  func.func @_nn_kernel(%arg0: i32, %arg1: memref<128x32xf32, #tpu.memory_space<vmem>>, %arg2: memref<16x32xf32, #tpu.memory_space<vmem>>, %arg3: memref<16x1xf32, #tpu.memory_space<vmem>>, %arg4: memref<8x16xf32, #tpu.memory_space<vmem>>, %arg5: memref<8x1xf32, #tpu.memory_space<vmem>>, %arg6: memref<1x8xf32, #tpu.memory_space<vmem>>, %arg7: memref<1x1xf32, #tpu.memory_space<vmem>>, %arg8: memref<1x128xf32, #tpu.memory_space<vmem>>) attributes {dimension_semantics = [#tpu.dimension_semantics<parallel>], iteration_bounds = array<i64: 2>, scalar_prefetch = 0 : i64, scratch_operands = 0 : i64, tpu.core_type = #tpu.core_type<tc>, window_params = [{transform_indices = @transform_0, window_bounds = array<i64: 128, 32>}, {pipeline_mode = #tpu.pipeline_mode<synchronous>, transform_indices = @transform_1, window_bounds = array<i64: 16, 32>}, {pipeline_mode = #tpu.pipeline_mode<synchronous>, transform_indices = @transform_2, window_bounds = array<i64: 16, 1>}, {pipeline_mode = #tpu.pipeline_mode<synchronous>, transform_indices = @transform_3, window_bounds = array<i64: 8, 16>}, {pipeline_mode = #tpu.pipeline_mode<synchronous>, transform_indices = @transform_4, window_bounds = array<i64: 8, 1>}, {pipeline_mode = #tpu.pipeline_mode<synchronous>, transform_indices = @transform_5, window_bounds = array<i64: 1, 8>}, {pipeline_mode = #tpu.pipeline_mode<synchronous>, transform_indices = @transform_6, window_bounds = array<i64: 1, 1>}, {transform_indices = @transform_7, window_bounds = array<i64: 1, 128>}]} {
    %c0 = arith.constant 0 : index
    %c0_0 = arith.constant 0 : index
    %0 = vector.load %arg1[%c0, %c0_0] : memref<128x32xf32, #tpu.memory_space<vmem>>, vector<128x32xf32>
    %c0_1 = arith.constant 0 : index
    %c0_2 = arith.constant 0 : index
    %1 = vector.load %arg2[%c0_1, %c0_2] : memref<16x32xf32, #tpu.memory_space<vmem>>, vector<16x32xf32>
    %cst = arith.constant dense<0.000000e+00> : vector<16x128xf32>
    %2 = tpu.matmul %1, %0, %cst {dimension_numbers = #tpu.dot_dimension_numbers<[1], [1], [0], [0], [0, 0, 1, 0], [], []>} : vector<16x32xf32>, vector<128x32xf32>, vector<16x128xf32> -> vector<16x128xf32>
    %c0_3 = arith.constant 0 : index
    %c0_4 = arith.constant 0 : index
    %3 = vector.load %arg3[%c0_3, %c0_4] : memref<16x1xf32, #tpu.memory_space<vmem>>, vector<16x1xf32>
    %4 = vector.broadcast %3 : vector<16x1xf32> to vector<16x128xf32>
    %5 = arith.addf %2, %4 : vector<16x128xf32>
    %cst_5 = arith.constant 0.000000e+00 : f32
    %6 = vector.broadcast %cst_5 : f32 to vector<16x128xf32>
    %7 = arith.maximumf %5, %6 : vector<16x128xf32>
    %c0_6 = arith.constant 0 : index
    %c0_7 = arith.constant 0 : index
    %8 = vector.load %arg4[%c0_6, %c0_7] : memref<8x16xf32, #tpu.memory_space<vmem>>, vector<8x16xf32>
    %cst_8 = arith.constant dense<0.000000e+00> : vector<8x128xf32>
    %9 = tpu.matmul %8, %7, %cst_8 {dimension_numbers = #tpu.dot_dimension_numbers<[1], [0], [0], [1], [0, 0, 1, 1], [], []>} : vector<8x16xf32>, vector<16x128xf32>, vector<8x128xf32> -> vector<8x128xf32>
    %c0_9 = arith.constant 0 : index
    %c0_10 = arith.constant 0 : index
    %10 = vector.load %arg5[%c0_9, %c0_10] : memref<8x1xf32, #tpu.memory_space<vmem>>, vector<8x1xf32>
    %11 = vector.broadcast %10 : vector<8x1xf32> to vector<8x128xf32>
    %12 = arith.addf %9, %11 : vector<8x128xf32>
    %cst_11 = arith.constant 0.000000e+00 : f32
    %13 = vector.broadcast %cst_11 : f32 to vector<8x128xf32>
    %14 = arith.maximumf %12, %13 : vector<8x128xf32>
    %c0_12 = arith.constant 0 : index
    %c0_13 = arith.constant 0 : index
    %15 = vector.load %arg6[%c0_12, %c0_13] : memref<1x8xf32, #tpu.memory_space<vmem>>, vector<1x8xf32>
    %cst_14 = arith.constant dense<0.000000e+00> : vector<1x128xf32>
    %16 = tpu.matmul %15, %14, %cst_14 {dimension_numbers = #tpu.dot_dimension_numbers<[1], [0], [0], [1], [0, 0, 1, 1], [], []>} : vector<1x8xf32>, vector<8x128xf32>, vector<1x128xf32> -> vector<1x128xf32>
    %c0_15 = arith.constant 0 : index
    %c0_16 = arith.constant 0 : index
    %17 = vector.load %arg7[%c0_15, %c0_16] : memref<1x1xf32, #tpu.memory_space<vmem>>, vector<1x1xf32>
    %18 = vector.broadcast %17 : vector<1x1xf32> to vector<1x128xf32>
    %19 = arith.addf %16, %18 : vector<1x128xf32>
    %cst_17 = arith.constant 0.000000e+00 : f32
    %20 = vector.broadcast %cst_17 : f32 to vector<1x128xf32>
    %21 = arith.maximumf %19, %20 : vector<1x128xf32>
    %c0_18 = arith.constant 0 : index
    %c0_19 = arith.constant 0 : index
    %22 = vector.load %arg8[%c0_18, %c0_19] : memref<1x128xf32, #tpu.memory_space<vmem>>, vector<1x128xf32>
    tpu.vector_store %arg8[%c0_18, %c0_19], %21 {strides = array<i32>} : memref<1x128xf32, #tpu.memory_space<vmem>>, vector<1x128xf32>,
    return
  }
  func.func @transform_0(%arg0: i32) -> (i32, i32) {
    %c0_i32 = arith.constant 0 : i32
    %c0_i32_0 = arith.constant 0 : i32
    return %arg0, %c0_i32 : i32, i32
  }
  func.func @transform_1(%arg0: i32) -> (i32, i32) {
    %c0_i32 = arith.constant 0 : i32
    %c0_i32_0 = arith.constant 0 : i32
    %c0_i32_1 = arith.constant 0 : i32
    return %c0_i32, %c0_i32_0 : i32, i32
  }
  func.func @transform_2(%arg0: i32) -> (i32, i32) {
    %c0_i32 = arith.constant 0 : i32
    %c0_i32_0 = arith.constant 0 : i32
    %c0_i32_1 = arith.constant 0 : i32
    return %c0_i32, %c0_i32_0 : i32, i32
  }
  func.func @transform_3(%arg0: i32) -> (i32, i32) {
    %c0_i32 = arith.constant 0 : i32
    %c0_i32_0 = arith.constant 0 : i32
    %c0_i32_1 = arith.constant 0 : i32
    return %c0_i32, %c0_i32_0 : i32, i32
  }
  func.func @transform_4(%arg0: i32) -> (i32, i32) {
    %c0_i32 = arith.constant 0 : i32
    %c0_i32_0 = arith.constant 0 : i32
    %c0_i32_1 = arith.constant 0 : i32
    return %c0_i32, %c0_i32_0 : i32, i32
  }
  func.func @transform_5(%arg0: i32) -> (i32, i32) {
    %c0_i32 = arith.constant 0 : i32
    %c0_i32_0 = arith.constant 0 : i32
    %c0_i32_1 = arith.constant 0 : i32
    return %c0_i32, %c0_i32_0 : i32, i32
  }
  func.func @transform_6(%arg0: i32) -> (i32, i32) {
    %c0_i32 = arith.constant 0 : i32
    %c0_i32_0 = arith.constant 0 : i32
    %c0_i32_1 = arith.constant 0 : i32
    return %c0_i32, %c0_i32_0 : i32, i32
  }
  func.func @transform_7(%arg0: i32) -> (i32, i32) {
    %c0_i32 = arith.constant 0 : i32
    %c0_i32_0 = arith.constant 0 : i32
    return %c0_i32, %arg0 : i32, i32
  }
}

</mosaic_0001>

<bundles_post_ra>
// kernel: nn_forward.1
= control target key start
LH: loop header
LB: loop body
LE: loop exit
PB: predicated region body
PF: predicated region fallthrough
CT: control target
= control target key end

     0   :  { %s875_s0 = inlined_call_operand.vmem [shape: f32[256,32], index: 0, kind: input, shape index: {}]   ;;  %s876_s1 = inlined_call_operand.vmem [shape: f32[16,32], index: 1, kind: input, shape index: {}]   ;;  %s877_s2 = inlined_call_operand.vmem [shape: f32[16,1], index: 2, kind: input, shape index: {}]   ;;  %s878_s3 = inlined_call_operand.vmem [shape: f32[8,16], index: 3, kind: input, shape index: {}]   ;;  %s879_s4 = inlined_call_operand.vmem [shape: f32[8,1], index: 4, kind: input, shape index: {}]   ;;  %s880_s5 = inlined_call_operand.vmem [shape: f32[1,8], index: 5, kind: input, shape index: {}]   ;;  %s881_s6 = inlined_call_operand.<no memory space> [shape: f32[1,1], index: 6, kind: input, shape index: {}]   ;;  %s882_s7 = inlined_call_operand.hbm [shape: f32[1,256], index: 7, kind: output, shape index: {}]  }
   0x1   :  { %v12_v0 = vstv %s881_s6 }
   0x2   :  { %13 = vst [vmem:[#allocation2] sm:$0x1] %v12_v0 }
   0x3   :  { %14 = vsyncpa [#allocation4], 0 }
   0x4   :  { %16 = vsyncpa [#allocation4 + $0x1], 0  ;;  %s718_s26 = smov 0   ;;  %s720_s27 = smov 0  }
   0x5   :  { %s722_s28 = smov 0   ;;  %s724_s29 = smov 0  }
   0x6 LB: > { %s739_s6 = sadd.s32 4294967295, %s672_s29   ;;  %s524_s30 = sadd.s32 4294967294, %s672_s29   ;;  %s672_s29 = sphi %s724_s29, %s888_s29   ;;  %s668_s28 = sphi %s722_s28, %s887_s28   ;;  %s664_s27 = sphi %s720_s27, %s886_s27   ;;  %s660_s26 = sphi %s718_s26, %s885_s26  }
   0x7   : > { %s743_s8 = sadd.s32 1, %s672_s29   ;;  %s181_s9 = sadd.s32 1, %s668_s28 }
   0x8   : > { %s178_s10 = ssub.s32 %s672_s29, %s743_s8  ;;  %p191_p0 = scmp.ne.s32.totalorder %s668_s28, %s664_s27 }
   0x9   : > { %p179_p1 = scmp.eq.s32.totalorder %s178_s10, 0  ;;  %p192_p2 = scmp.eq.s32.totalorder %s739_s6, 1 }
   0xa   : > { %p197_p3 = scmp.ne.s32.totalorder %s664_s27, %s660_s26  ;;  %p198_p4 = scmp.eq.s32.totalorder %s524_s30, 1 }
   0xb   : > { %s754_s11 = scalar_select %p179_p1, %s668_s28, %s181_s9  }
   0xc   : > { %p756_p5 = por %p192_p2, %p191_p0  ;;  %p760_p6 = por %p198_p4, %p197_p3 }
   0xd   : > { %p527_p7 = scmp.ge.s32.totalorder %s672_s29, 1  ;;  %p243_p8 = scmp.lt.s32.totalorder %s672_s29, 3 }
   0xf   : > { %p244_p9 = pnand %p527_p7, %p243_p8 }
  0x10   : > { %s528_s14 = sshll.u32 (!%p244_p9), %s739_s6, 4  ;;  %s465_s21 = scalar_lea.hbm (!%p244_p9), %s882_s7, %s739_s6 }
  0x11   : > { %247 = sbr.rel (%p244_p9) target bundleno = 498 (0x1f2), region = 48  ;;  %p275_p10 = scmp.lt.s32.totalorder (!%p244_p9), %s528_s14, 31 }
  0x12   : > { %s469_s24 = sshll.u32 (!%p244_p9), %s465_s21, 4  ;;  %s470_s24 = int_to_ptr.hbm [resolvable:$true] %s469_s24 }
  0x13   : > { %s624_s30 = sshra.s32 (!%p244_p9), %s470_s24, 4  ;;  %s625_s30 = int_to_ptr.hbm [resolvable:$true] %s624_s30 }
  0x14   : > { %s626_s9 = scalar_lea.hbm (!%p244_p9), %s625_s30, 1  ;;  %p631_p0 = scmp.lt.s32.totalorder (!%p244_p9), %s625_s30, %s882_s7 }
  0x15   : > { %p627_p11 = scmp.ne.s32.totalorder (!%p244_p9), %s625_s30, %s626_s9 }
  0x16   : > { %s890_s14 = smov (!%p275_p10, %s528_s14), 31  ;;  %vm310_vm0 = vcmask 261120   ;;  %v299_v10 = vld [vmem:[%s877_s2 + $0x8] sm:$0xff]  ;;  %v674_v12 = vmov 0   ;;  %v298_v14 = vld [vmem:[%s877_s2] sm:$0xff]  ;;  %vm397_vm1 = vcmask 130048  }
  0x17   : > { %s529_s15 = sshll.u32 %s890_s14, 3  ;;  %608 = vset.pattern.permute.xlu0 %v674_v12  ;;  %609 = vset.pattern.permute.xlu1 %v674_v12  ;;  %v296_v20 = vld [vmem:[%s876_s1] sm:$0xff]  ;;  %v297_v21 = vld [vmem:[%s876_s1 + $0x8] sm:$0xff]  ;;  %vm430_vm2 = vcmask 64512   ;;  %p628_p12 = pnand %p627_p11, %p756_p5 }
  0x18   : > { %s770_s18 = scalar_lea.vmem %s875_s0, %s529_s15  ;;  %307 = vperm.xlu0 %608, %v299_v10   ;;  %v391_v22 = vld [vmem:[%s879_s4] sm:$0xff]  ;;  %s630_s14 = scalar_lea.hbm %s882_s7, 2 }
  0x19   : > { %v295_v1 = vld [vmem:[%s770_s18 + $0x78] sm:$0xff]  ;;  %v294_v2 = vld [vmem:[%s770_s18 + $0x70] sm:$0xff]  ;;  %v293_v3 = vld [vmem:[%s770_s18 + $0x68] sm:$0xff]  ;;  %394 = vperm.xlu1 %609, %v391_v22   ;;  %p629_p13 = pneg %p628_p12  ;;  %p632_p1 = scmp.lt.s32.totalorder %s630_s14, %s626_s9 }
  0x1a   : > { %530 = vmatpush.xpose.msk.msra.mxu0 %vm310_vm0, %v295_v1  ;;  %552 = vmatpush.xpose.msk.msra.mxu3 %vm310_vm0, %v295_v1  ;;  %v292_v4 = vld [vmem:[%s770_s18 + $0x60] sm:$0xff]  ;;  %v291_v5 = vld [vmem:[%s770_s18 + $0x58] sm:$0xff]  ;;  %v290_v6 = vld [vmem:[%s770_s18 + $0x50] sm:$0xff] }
  0x1b   : > { %v289_v7 = vld [vmem:[%s770_s18 + $0x48] sm:$0xff]  ;;  %v288_v8 = vld [vmem:[%s770_s18 + $0x40] sm:$0xff]  ;;  %v287_v9 = vld [vmem:[%s770_s18 + $0x38] sm:$0xff]  ;;  %p633_p2 = por %p632_p1, %p631_p0 }
  0x1c   : > { %v286_v11 = vld [vmem:[%s770_s18 + $0x30] sm:$0xff]  ;;  %v285_v13 = vld [vmem:[%s770_s18 + $0x28] sm:$0xff]  ;;  %v284_v15 = vld [vmem:[%s770_s18 + $0x20] sm:$0xff] }
  0x1d   : > { %v283_v16 = vld [vmem:[%s770_s18 + $0x18] sm:$0xff]  ;;  %v282_v17 = vld [vmem:[%s770_s18 + $0x10] sm:$0xff]  ;;  %v281_v18 = vld [vmem:[%s770_s18 + $0x8] sm:$0xff]  ;;  %p634_p3 = pnand %p633_p2, %p629_p13 }
  0x1e   : > { %531 = vmatpush.xpose.msk.msra.mxu0 %vm310_vm0, %v294_v2  ;;  %553 = vmatpush.xpose.msk.msra.mxu3 %vm310_vm0, %v294_v2  ;;  %v280_v19 = vld [vmem:[%s770_s18] sm:$0xff]  ;;  %s272_s18 = sand.u32 1, %s664_s27  }
  0x1f   : > { %v423_v23 = vld [vmem:[#allocation2] sm:$0x1]  ;;  %s273_s22 = scalar_lea.vmem [#allocation3], %s272_s18  ;;  %s457_s25 = scalar_lea.sflag [#allocation4], %s272_s18 }
  0x20   : > { %302 = vperm.xlu0 %608, %v298_v14   ;;  %v390_v32 = vld [vmem:[%s878_s3] sm:$0xff]  ;;  %s467_s23 = sshll.u32 %s273_s22, 4  ;;  %s468_s23 = int_to_ptr.vmem [resolvable:$true] %s467_s23 }
  0x21   : > { %426 = vperm.xlu1 %609, %v423_v23   ;;  %v422_v37 = vld [vmem:[%s880_s5] sm:$0x1] }
  0x22   : > { %532 = vmatpush.xpose.msk.msra.mxu0 %vm310_vm0, %v293_v3  ;;  %554 = vmatpush.xpose.msk.msra.mxu3 %vm310_vm0, %v293_v3 }
  0x26   : > { %533 = vmatpush.xpose.msk.msra.mxu0 %vm310_vm0, %v292_v4  ;;  %555 = vmatpush.xpose.msk.msra.mxu3 %vm310_vm0, %v292_v4 }
  0x2a   : > { %534 = vmatpush.xpose.msk.msra.mxu0 %vm310_vm0, %v291_v5  ;;  %556 = vmatpush.xpose.msk.msra.mxu3 %vm310_vm0, %v291_v5 }
  0x2e   : > { %535 = vmatpush.xpose.msk.msra.mxu0 %vm310_vm0, %v290_v6  ;;  %557 = vmatpush.xpose.msk.msra.mxu3 %vm310_vm0, %v290_v6 }
  0x32   : > { %536 = vmatpush.xpose.msk.msra.mxu0 %vm310_vm0, %v289_v7  ;;  %558 = vmatpush.xpose.msk.msra.mxu3 %vm310_vm0, %v289_v7 }
  0x36   : > { %537 = vmatpush.xpose.msk.msra.mxu0 %vm310_vm0, %v288_v8  ;;  %559 = vmatpush.xpose.msk.msra.mxu3 %vm310_vm0, %v288_v8 }
  0x3a   : > { %538 = vmatpush.xpose.msk.msra.mxu0 %vm310_vm0, %v287_v9  ;;  %560 = vmatpush.xpose.msk.msra.mxu3 %vm310_vm0, %v287_v9 }
  0x3e   : > { %539 = vmatpush.xpose.msk.msra.mxu0 %vm310_vm0, %v286_v11  ;;  %561 = vmatpush.xpose.msk.msra.mxu3 %vm310_vm0, %v286_v11 }
  0x42   : > { %540 = vmatpush.xpose.msk.msra.mxu0 %vm310_vm0, %v285_v13  ;;  %562 = vmatpush.xpose.msk.msra.mxu3 %vm310_vm0, %v285_v13 }
  0x46   : > { %541 = vmatpush.xpose.msk.msra.mxu0 %vm310_vm0, %v284_v15  ;;  %563 = vmatpush.xpose.msk.msra.mxu3 %vm310_vm0, %v284_v15 }
  0x4a   : > { %542 = vmatpush.xpose.msk.msra.mxu0 %vm310_vm0, %v283_v16  ;;  %564 = vmatpush.xpose.msk.msra.mxu3 %vm310_vm0, %v283_v16 }
  0x4e   : > { %543 = vmatpush.xpose.msk.msra.mxu0 %vm310_vm0, %v282_v17  ;;  %565 = vmatpush.xpose.msk.msra.mxu3 %vm310_vm0, %v282_v17 }
  0x52   : > { %544 = vmatpush.xpose.msk.msra.mxu0 %vm310_vm0, %v281_v18  ;;  %566 = vmatpush.xpose.msk.msra.mxu3 %vm310_vm0, %v281_v18 }
  0x56   : > { %545 = vmatpush.xpose.msk.msra.mxu0 %vm310_vm0, %v280_v19  ;;  %567 = vmatpush.xpose.msk.msra.mxu3 %vm310_vm0, %v280_v19 }
  0x59   : > { %546 = vmatmul.msk.f32.vlgmr.msra.gmra.mxu0 %vm310_vm0, %v296_v20  ;;  %547 = vmatmul.msk.f32.vlgmr.msra.gmra.mxu3 %vm310_vm0, %v297_v21 }
  0x8a   : > { %v308_v24 = vpop.permute.xlu0 %307 }
  0x8b   : > { %v395_v33 = vpop.permute.xlu1 %394 }
  0x92   : > { %v303_v25 = vpop.permute.xlu0 %302 }
  0x93   : > { %v427_v38 = vpop.permute.xlu1 %426 }
  0x94   : > { %v429_v39 = vperm.slane %v427_v38, 0 }
  0xd6   : > { %v382_v26 = vpop.f32.mrf.mxu0 }
  0xd7   : > { %v383_v28 = vadd.f32 %v382_v26, %v303_v25 }
  0xd9   : > { %v388_v31 = vmax.f32 %v383_v28, 0.0 }
  0xdc   : > { %v385_v27 = vpop.f32.mrf.mxu3 }
  0xdd   : > { %v386_v29 = vadd.f32 %v385_v27, %v308_v24 }
  0xdf   : > { %v389_v30 = vmax.f32 %v386_v29, 0.0 }
  0xe1   : > { %415 = vmatpush.msra.mxu1 %v389_v30 }
  0xe3   : > { %416 = vmatpush.msra.mxu1 %v388_v31 }
  0xe4   : > { %548 = vmatmul.msk.f32.vlgmr.msra.gmra.mxu1 %vm397_vm1, %v390_v32 }
 0x161   : > { %v418_v34 = vpop.f32.mrf.mxu1 }
 0x162   : > { %v419_v35 = vadd.f32 %v418_v34, %v395_v33 }
 0x164   : > { %v421_v36 = vmax.f32 %v419_v35, 0.0 }
 0x166   : > { %449 = vmatpush.msra.mxu2 %v421_v36 }
 0x167   : > { %549 = vmatmul.msk.f32.vlgmr.msra.gmra.mxu2 %vm430_vm2, %v422_v37 }
 0x1ea   : > { %v451_v40 = vpop.f32.mrf.mxu2 }
 0x1eb   : > { %v452_v41 = vadd.f32 %v451_v40, %v429_v39 }
 0x1ed   : > { %v454_v42 = vmax.f32 %v452_v41, 0.0 }
 0x1ef   : > { %455 = vst [vmem:[%s273_s22] sm:$0x1] %v454_v42 }
 0x1f0   : > { %637 = shalt.err (!%p634_p3)
}
 0x1f1   : > { %568 = dma.vmem_to_hbm [thread:$0]  (%p756_p5), %s468_s23, 16, %s470_s24, %s457_s25  }
 0x1f2 PF: > { %p574_p4 = scmp.ge.s32.totalorder %s672_s29, 2  ;;  %s481_s17 = sand.u32 1, %s660_s26  }
 0x1f3   : > { %s482_s18 = scalar_lea.sflag [#allocation4], %s481_s17 }
 0x1f4   : > { %p571_p7 = pnand %p574_p4, %p760_p6 }
 0x1f6   : > { %p572_p8 = pneg %p571_p7 }
 0x1f8   : > { %655 = dma.done.wait (%p572_p8), %s482_s18, 16  }
 0x1f9   : > { %657 = vsyncadd (%p572_p8), %s482_s18, 4294967280  ;;  %p19_p9 = scmp.ge.s32.totalorder %s743_s8, 4   ;;  %s885_s26 = smov %s664_s27 }
 0x1fa   : > { %s886_s27 = smov %s668_s28  ;;  %s887_s28 = smov %s754_s11 }
 0x1fb   : > { %s888_s29 = smov %s743_s8  ;;  %21 = sbr.rel (!%p19_p9) target bundleno = 6 (0x6), region = 83 }
 0x200   :  { %487 = vsyncpa [#allocation4], 1 }
 0x201   :  { %489 = vsyncpa [#allocation4 + $0x1], 1 }

</bundles_post_ra>
